<compile_context>
chip_gen: v5e
topology: v5e:2x2
jax: 0.10.0
libtpu: 0.0.40
codegen_flags: <defaults>
</compile_context>

<pallas_src>
import functools
import math

import jax
import jax.numpy as jnp
import numpy as np
from jax.experimental import pallas as pl
from jax.experimental.pallas import tpu as pltpu

_SUBLANE = 8
_TARGET_TILE_BYTES = 2 * 1024 * 1024   # ~2 MiB q_locals tile per grid step
_MAX_BLOCK_B = 4096


def _round_up(x, m):
    return ((x + m - 1) // m) * m


def _dual_tensorcore():
    # Best-effort detection: only v7x-class parts have 2 TensorCores per chip.
    try:
        return "v7" in jax.devices()[0].device_kind.lower()
    except Exception:  # CPU / interpret mode / anything unexpected
        return False


def _pick_block_b(B, T, D, itemsize):
    """Batch rows per grid step: ~2 MiB of q_locals per step, sublane-aligned."""
    row_bytes = max(T * D * itemsize, 1)
    target = max(_SUBLANE, min(_MAX_BLOCK_B, _TARGET_TILE_BYTES // row_bytes))
    dual = _dual_tensorcore()
    if B <= target:
        # Whole batch in one block (block == full dim: no sublane-alignment constraint,
        # no padding, no output slicing).  On v7x split mid-size batches in two so the
        # "parallel" axis can shard across both TensorCores.
        if dual and B >= 16 * _SUBLANE:
            return min(B, _round_up(pl.cdiv(B, 2), _SUBLANE))
        return B
    nb = pl.cdiv(B, target)
    if dual and nb % 2 == 1:
        nb += 1                       # even number of blocks -> both TensorCores busy
    return min(B, _round_up(pl.cdiv(B, nb), _SUBLANE))


def _attn_agg_kernel(qb_ref, ql_ref, w_ref, out_ref, attn_ref, *, T, D, scale):
    # qb_ref:   (TB, D)      block of q_base
    # ql_ref:   (TB, T*D)    block of q_locals, lane-dense (tokens laid out along lanes)
    # w_ref:    (D, D)       raw nn.Linear weight (out_features, in_features); resident
    # out_ref:  (TB, D)      (q_base + local_q) / 2
    # attn_ref: (TB, T)      softmax weights, float32
    qb = qb_ref[...]

    # Associativity rewrite: one (TB, D) @ (D, D) MXU matmul per block replaces the
    # per-token projection W(q_locals) and its transpose entirely.
    v = jnp.dot(qb, w_ref[...], preferred_element_type=jnp.float32)       # (TB, D) f32

    # Scores: static unroll over tokens (T is small).  Each token chunk is a static
    # lane slice of the lane-dense tile -- no (TB, T, D) f32 temporaries materialized.
    cols = []
    for t in range(T):
        ql_t = ql_ref[:, t * D:(t + 1) * D].astype(jnp.float32)           # (TB, D)
        cols.append(jnp.sum(v * ql_t, axis=-1, keepdims=True))            # (TB, 1)
    scores = jnp.concatenate(cols, axis=-1) * scale                       # (TB, T)

    # Numerically stable softmax with an EXACT divide (parity with the PyTorch module;
    # the approx reciprocal previously perturbed the weights by ~1e-3).
    m = jnp.max(scores, axis=-1, keepdims=True)
    e = jnp.exp(scores - m)
    w = e / jnp.sum(e, axis=-1, keepdims=True)                            # (TB, T) f32

    # Aggregation: local_q = sum_t w_t * q_locals_t, unrolled, single (TB, D) f32
    # accumulator seeded with q_base so the epilogue is one scale + cast.
    acc = qb.astype(jnp.float32)
    for t in range(T):
        ql_t = ql_ref[:, t * D:(t + 1) * D].astype(jnp.float32)
        acc = acc + w[:, t:t + 1] * ql_t
    out_ref[...] = (acc * 0.5).astype(out_ref.dtype)
    # NOTE: attn is stored (TB, T); for tiny T this is a masked partial store, but a
    # lane-dense transposed layout would need a wrapper-side transpose (an extra HBM
    # pass over attn) -- not worth it since attn is D-times smaller than q_locals.
    attn_ref[...] = w


def attn_agg_v2(q_base, q_locals, W, *, block_b=None):
    """Pallas implementation of AttnAggV2.forward.

    q_base:   (B, D)
    q_locals: (B, T, D)
    W:        (D, D)  nn.Linear weight, exactly as stored by PyTorch (out, in)
    returns:  ((B, D) in q_base.dtype, (B, T) attention weights in float32)
    """
    B, D = q_base.shape
    Bq, T, Dq = q_locals.shape
    assert Bq == B and Dq == D and W.shape == (D, D)
    scale = 1.0 / math.sqrt(D)

    # TODO(synk): the in-kernel token loop is a static unroll; for very large
    # tokens_nums a fori_loop / slab formulation would be preferable.

    # Lane-dense view of q_locals: contiguous reshape, no copy, no transpose.
    ql2 = q_locals.reshape(B, T * D)

    if block_b is None:
        block_b = _pick_block_b(B, T, D, jnp.dtype(q_locals.dtype).itemsize)
    block_b = max(1, min(int(block_b), B))
    if block_b < B:
        block_b = min(B, _round_up(block_b, _SUBLANE))
    nb = pl.cdiv(B, block_b)
    # If block_b does not divide B (only possible for very large B with the default
    # sizing), the last block's out-of-range rows are handled by Pallas' partial-block
    # masking -- no jnp.pad HBM round trip of q_locals and no output slicing.

    in_itemsize = jnp.dtype(q_base.dtype).itemsize
    cost = pl.CostEstimate(
        flops=2 * B * D * D + 4 * B * T * D,
        transcendentals=B * T,
        bytes_accessed=2 * B * D * in_itemsize
        + B * T * D * jnp.dtype(q_locals.dtype).itemsize
        + D * D * jnp.dtype(W.dtype).itemsize
        + B * T * 4,
    )

    kernel = functools.partial(_attn_agg_kernel, T=T, D=D, scale=scale)

    out, attn = pl.pallas_call(
        kernel,
        out_shape=(
            jax.ShapeDtypeStruct((B, D), q_base.dtype),
            jax.ShapeDtypeStruct((B, T), jnp.float32),
        ),
        grid_spec=pltpu.PrefetchScalarGridSpec(
            num_scalar_prefetch=0,
            grid=(nb,),
            in_specs=[
                pl.BlockSpec((block_b, D), lambda b: (b, 0)),        # q_base rows
                pl.BlockSpec((block_b, T * D), lambda b: (b, 0)),    # q_locals (lane-dense)
                pl.BlockSpec((D, D), lambda b: (0, 0)),              # W (resident)
            ],
            out_specs=(
                pl.BlockSpec((block_b, D), lambda b: (b, 0)),
                pl.BlockSpec((block_b, T), lambda b: (b, 0)),
            ),
        ),
        compiler_params=pltpu.CompilerParams(
            dimension_semantics=("parallel",),
            # Raise v5e's 16 MiB scoped-VMEM default; comfortably under v7x's 64 MiB
            # physical VMEM.  Blocks are sized so the double-buffered working set is
            # only a few MiB anyway.
            vmem_limit_bytes=32 * 1024 * 1024,
        ),
        cost_estimate=cost,
    )(q_base, ql2, W)

    return out, attn


def _reference(q_base, q_locals, W):
    """Pure-JAX reference mirroring the PyTorch forward (full f32 matmul precision)."""
    D = q_base.shape[-1]
    hp = jax.lax.Precision.HIGHEST
    proj = jnp.einsum("btd,ed->bte", q_locals, W, precision=hp)       # W(q_locals)
    scores = jnp.einsum("bd,btd->bt", q_base, proj, precision=hp) / math.sqrt(D)
    w = jax.nn.softmax(scores, axis=-1)
    local_q = jnp.einsum("bt,btd->bd", w, q_locals, precision=hp)
    return (q_base + local_q) / 2.0, w


def _check(B, T, D, seed=0, block_b=None):
    key = jax.random.PRNGKey(seed)
    k1, k2, k3 = jax.random.split(key, 3)
    q_base = jax.random.normal(k1, (B, D), dtype=jnp.float32)
    q_locals = jax.random.normal(k2, (B, T, D), dtype=jnp.float32)
    bound = 1.0 / math.sqrt(D)  # PyTorch-style uniform init for Linear(D, D, bias=False)
    W = jax.random.uniform(k3, (D, D), minval=-bound, maxval=bound, dtype=jnp.float32)

    out, attn = attn_agg_v2(q_base, q_locals, W, block_b=block_b)
    out, attn = jax.block_until_ready((out, attn))
    ref_out, ref_attn = _reference(q_base, q_locals, W)

    out_np, attn_np = np.asarray(out), np.asarray(attn)
    assert out_np.shape == (B, D) and attn_np.shape == (B, T)
    # Structural check (precision-independent): softmax rows sum to 1 exactly-ish.
    assert np.allclose(attn_np.sum(axis=-1), 1.0, atol=1e-5), "attn rows must sum to 1"
    # Value checks vs. the full-precision reference (tolerance leaves headroom for
    # MXU matmul rounding on real hardware; actual error is typically < 1e-5).
    err_o = np.max(np.abs(out_np - np.asarray(ref_out)))
    err_a = np.max(np.abs(attn_np - np.asarray(ref_attn)))
    assert np.allclose(out_np, np.asarray(ref_out), atol=5e-3, rtol=5e-3), f"out err={err_o}"
    assert np.allclose(attn_np, np.asarray(ref_attn), atol=5e-3, rtol=5e-3), f"attn err={err_a}"


if __name__ == "__main__":
    # Primary small example: batch=2, tokens_nums=8, n_actions (= output_dim) = 32.
    _check(B=2, T=8, D=32)
    # Batch not a multiple of 8: single full-batch block, no padding, no slicing.
    _check(B=20, T=8, D=32)
    # Multi-block grid path (4 grid steps over the batch, even division).
    _check(B=64, T=8, D=32, block_b=16)
    print("KERNEL_OK")
</pallas_src>

<mosaic_0001>
module attributes {stable_mosaic.version = 11 : i64} {
  func.func @_attn_agg_kernel(%arg0: i32, %arg1: memref<2x32xf32, #tpu.memory_space<vmem>>, %arg2: memref<2x256xf32, #tpu.memory_space<vmem>>, %arg3: memref<32x32xf32, #tpu.memory_space<vmem>>, %arg4: memref<2x32xf32, #tpu.memory_space<vmem>>, %arg5: memref<2x8xf32, #tpu.memory_space<vmem>>) attributes {dimension_semantics = [#tpu.dimension_semantics<parallel>], iteration_bounds = array<i64: 1>, scalar_prefetch = 0 : i64, scratch_operands = 0 : i64, tpu.core_type = #tpu.core_type<tc>, window_params = [{transform_indices = @transform_0, window_bounds = array<i64: 2, 32>}, {transform_indices = @transform_1, window_bounds = array<i64: 2, 256>}, {pipeline_mode = #tpu.pipeline_mode<synchronous>, transform_indices = @transform_2, window_bounds = array<i64: 32, 32>}, {transform_indices = @transform_3, window_bounds = array<i64: 2, 32>}, {transform_indices = @transform_4, window_bounds = array<i64: 2, 8>}]} {
    %c0 = arith.constant 0 : index
    %c0_0 = arith.constant 0 : index
    %0 = vector.load %arg1[%c0, %c0_0] : memref<2x32xf32, #tpu.memory_space<vmem>>, vector<2x32xf32>
    %c0_1 = arith.constant 0 : index
    %c0_2 = arith.constant 0 : index
    %1 = vector.load %arg3[%c0_1, %c0_2] : memref<32x32xf32, #tpu.memory_space<vmem>>, vector<32x32xf32>
    %cst = arith.constant dense<0.000000e+00> : vector<2x32xf32>
    %2 = tpu.matmul %0, %1, %cst {dimension_numbers = #tpu.dot_dimension_numbers<[1], [0], [0], [1], [0, 0, 1, 1], [], []>} : vector<2x32xf32>, vector<32x32xf32>, vector<2x32xf32> -> vector<2x32xf32>
    %c0_3 = arith.constant 0 : index
    %c0_4 = arith.constant 0 : index
    %3 = vector.load %arg2[%c0_3, %c0_4] : memref<2x256xf32, #tpu.memory_space<vmem>>, vector<2x32xf32>
    %4 = arith.mulf %2, %3 : vector<2x32xf32>
    %cst_5 = arith.constant dense<0.000000e+00> : vector<2xf32>
    %5 = vector.multi_reduction <add>, %4, %cst_5 [1] : vector<2x32xf32> to vector<2xf32>
    %6 = vector.shape_cast %5 : vector<2xf32> to vector<2x1xf32>
    %c0_6 = arith.constant 0 : index
    %c32 = arith.constant 32 : index
    %7 = vector.load %arg2[%c0_6, %c32] : memref<2x256xf32, #tpu.memory_space<vmem>>, vector<2x32xf32>
    %8 = arith.mulf %2, %7 : vector<2x32xf32>
    %cst_7 = arith.constant dense<0.000000e+00> : vector<2xf32>
    %9 = vector.multi_reduction <add>, %8, %cst_7 [1] : vector<2x32xf32> to vector<2xf32>
    %10 = vector.shape_cast %9 : vector<2xf32> to vector<2x1xf32>
    %c0_8 = arith.constant 0 : index
    %c64 = arith.constant 64 : index
    %11 = vector.load %arg2[%c0_8, %c64] : memref<2x256xf32, #tpu.memory_space<vmem>>, vector<2x32xf32>
    %12 = arith.mulf %2, %11 : vector<2x32xf32>
    %cst_9 = arith.constant dense<0.000000e+00> : vector<2xf32>
    %13 = vector.multi_reduction <add>, %12, %cst_9 [1] : vector<2x32xf32> to vector<2xf32>
    %14 = vector.shape_cast %13 : vector<2xf32> to vector<2x1xf32>
    %c0_10 = arith.constant 0 : index
    %c96 = arith.constant 96 : index
    %15 = vector.load %arg2[%c0_10, %c96] : memref<2x256xf32, #tpu.memory_space<vmem>>, vector<2x32xf32>
    %16 = arith.mulf %2, %15 : vector<2x32xf32>
    %cst_11 = arith.constant dense<0.000000e+00> : vector<2xf32>
    %17 = vector.multi_reduction <add>, %16, %cst_11 [1] : vector<2x32xf32> to vector<2xf32>
    %18 = vector.shape_cast %17 : vector<2xf32> to vector<2x1xf32>
    %c0_12 = arith.constant 0 : index
    %c128 = arith.constant 128 : index
    %19 = vector.load %arg2[%c0_12, %c128] : memref<2x256xf32, #tpu.memory_space<vmem>>, vector<2x32xf32>
    %20 = arith.mulf %2, %19 : vector<2x32xf32>
    %cst_13 = arith.constant dense<0.000000e+00> : vector<2xf32>
    %21 = vector.multi_reduction <add>, %20, %cst_13 [1] : vector<2x32xf32> to vector<2xf32>
    %22 = vector.shape_cast %21 : vector<2xf32> to vector<2x1xf32>
    %c0_14 = arith.constant 0 : index
    %c160 = arith.constant 160 : index
    %23 = vector.load %arg2[%c0_14, %c160] : memref<2x256xf32, #tpu.memory_space<vmem>>, vector<2x32xf32>
    %24 = arith.mulf %2, %23 : vector<2x32xf32>
    %cst_15 = arith.constant dense<0.000000e+00> : vector<2xf32>
    %25 = vector.multi_reduction <add>, %24, %cst_15 [1] : vector<2x32xf32> to vector<2xf32>
    %26 = vector.shape_cast %25 : vector<2xf32> to vector<2x1xf32>
    %c0_16 = arith.constant 0 : index
    %c192 = arith.constant 192 : index
    %27 = vector.load %arg2[%c0_16, %c192] : memref<2x256xf32, #tpu.memory_space<vmem>>, vector<2x32xf32>
    %28 = arith.mulf %2, %27 : vector<2x32xf32>
    %cst_17 = arith.constant dense<0.000000e+00> : vector<2xf32>
    %29 = vector.multi_reduction <add>, %28, %cst_17 [1] : vector<2x32xf32> to vector<2xf32>
    %30 = vector.shape_cast %29 : vector<2xf32> to vector<2x1xf32>
    %c0_18 = arith.constant 0 : index
    %c224 = arith.constant 224 : index
    %31 = vector.load %arg2[%c0_18, %c224] : memref<2x256xf32, #tpu.memory_space<vmem>>, vector<2x32xf32>
    %32 = arith.mulf %2, %31 : vector<2x32xf32>
    %cst_19 = arith.constant dense<0.000000e+00> : vector<2xf32>
    %33 = vector.multi_reduction <add>, %32, %cst_19 [1] : vector<2x32xf32> to vector<2xf32>
    %34 = vector.shape_cast %33 : vector<2xf32> to vector<2x1xf32>
    %35 = tpu.concatenate %6, %10, %14, %18, %22, %26, %30, %34 in 1 : vector<2x1xf32>, vector<2x1xf32>, vector<2x1xf32>, vector<2x1xf32>, vector<2x1xf32>, vector<2x1xf32>, vector<2x1xf32>, vector<2x1xf32> -> vector<2x8xf32>
    %cst_20 = arith.constant 0.176776692 : f32
    %36 = vector.broadcast %cst_20 : f32 to vector<2x8xf32>
    %37 = arith.mulf %35, %36 : vector<2x8xf32>
    %cst_21 = arith.constant dense<0xFF800000> : vector<2xf32>
    %38 = vector.multi_reduction <maximumf>, %37, %cst_21 [1] : vector<2x8xf32> to vector<2xf32>
    %39 = vector.shape_cast %38 : vector<2xf32> to vector<2x1xf32>
    %40 = vector.broadcast %39 : vector<2x1xf32> to vector<2x8xf32>
    %41 = arith.subf %37, %40 : vector<2x8xf32>
    %42 = math.exp %41 : vector<2x8xf32>
    %cst_22 = arith.constant dense<0.000000e+00> : vector<2xf32>
    %43 = vector.multi_reduction <add>, %42, %cst_22 [1] : vector<2x8xf32> to vector<2xf32>
    %44 = vector.shape_cast %43 : vector<2xf32> to vector<2x1xf32>
    %45 = vector.broadcast %44 : vector<2x1xf32> to vector<2x8xf32>
    %46 = arith.divf %42, %45 : vector<2x8xf32>
    %c0_23 = arith.constant 0 : index
    %c0_24 = arith.constant 0 : index
    %47 = vector.load %arg2[%c0_23, %c0_24] : memref<2x256xf32, #tpu.memory_space<vmem>>, vector<2x32xf32>
    %48 = vector.extract_strided_slice %46 {offsets = [0, 0], sizes = [2, 1], strides = [1, 1]} : vector<2x8xf32> to vector<2x1xf32>
    %49 = vector.broadcast %48 : vector<2x1xf32> to vector<2x32xf32>
    %50 = arith.mulf %49, %47 : vector<2x32xf32>
    %51 = arith.addf %0, %50 : vector<2x32xf32>
    %c0_25 = arith.constant 0 : index
    %c32_26 = arith.constant 32 : index
    %52 = vector.load %arg2[%c0_25, %c32_26] : memref<2x256xf32, #tpu.memory_space<vmem>>, vector<2x32xf32>
    %53 = vector.extract_strided_slice %46 {offsets = [0, 1], sizes = [2, 1], strides = [1, 1]} : vector<2x8xf32> to vector<2x1xf32>
    %54 = vector.broadcast %53 : vector<2x1xf32> to vector<2x32xf32>
    %55 = arith.mulf %54, %52 : vector<2x32xf32>
    %56 = arith.addf %51, %55 : vector<2x32xf32>
    %c0_27 = arith.constant 0 : index
    %c64_28 = arith.constant 64 : index
    %57 = vector.load %arg2[%c0_27, %c64_28] : memref<2x256xf32, #tpu.memory_space<vmem>>, vector<2x32xf32>
    %58 = vector.extract_strided_slice %46 {offsets = [0, 2], sizes = [2, 1], strides = [1, 1]} : vector<2x8xf32> to vector<2x1xf32>
    %59 = vector.broadcast %58 : vector<2x1xf32> to vector<2x32xf32>
    %60 = arith.mulf %59, %57 : vector<2x32xf32>
    %61 = arith.addf %56, %60 : vector<2x32xf32>
    %c0_29 = arith.constant 0 : index
    %c96_30 = arith.constant 96 : index
    %62 = vector.load %arg2[%c0_29, %c96_30] : memref<2x256xf32, #tpu.memory_space<vmem>>, vector<2x32xf32>
    %63 = vector.extract_strided_slice %46 {offsets = [0, 3], sizes = [2, 1], strides = [1, 1]} : vector<2x8xf32> to vector<2x1xf32>
    %64 = vector.broadcast %63 : vector<2x1xf32> to vector<2x32xf32>
    %65 = arith.mulf %64, %62 : vector<2x32xf32>
    %66 = arith.addf %61, %65 : vector<2x32xf32>
    %c0_31 = arith.constant 0 : index
    %c128_32 = arith.constant 128 : index
    %67 = vector.load %arg2[%c0_31, %c128_32] : memref<2x256xf32, #tpu.memory_space<vmem>>, vector<2x32xf32>
    %68 = vector.extract_strided_slice %46 {offsets = [0, 4], sizes = [2, 1], strides = [1, 1]} : vector<2x8xf32> to vector<2x1xf32>
    %69 = vector.broadcast %68 : vector<2x1xf32> to vector<2x32xf32>
    %70 = arith.mulf %69, %67 : vector<2x32xf32>
    %71 = arith.addf %66, %70 : vector<2x32xf32>
    %c0_33 = arith.constant 0 : index
    %c160_34 = arith.constant 160 : index
    %72 = vector.load %arg2[%c0_33, %c160_34] : memref<2x256xf32, #tpu.memory_space<vmem>>, vector<2x32xf32>
    %73 = vector.extract_strided_slice %46 {offsets = [0, 5], sizes = [2, 1], strides = [1, 1]} : vector<2x8xf32> to vector<2x1xf32>
    %74 = vector.broadcast %73 : vector<2x1xf32> to vector<2x32xf32>
    %75 = arith.mulf %74, %72 : vector<2x32xf32>
    %76 = arith.addf %71, %75 : vector<2x32xf32>
    %c0_35 = arith.constant 0 : index
    %c192_36 = arith.constant 192 : index
    %77 = vector.load %arg2[%c0_35, %c192_36] : memref<2x256xf32, #tpu.memory_space<vmem>>, vector<2x32xf32>
    %78 = vector.extract_strided_slice %46 {offsets = [0, 6], sizes = [2, 1], strides = [1, 1]} : vector<2x8xf32> to vector<2x1xf32>
    %79 = vector.broadcast %78 : vector<2x1xf32> to vector<2x32xf32>
    %80 = arith.mulf %79, %77 : vector<2x32xf32>
    %81 = arith.addf %76, %80 : vector<2x32xf32>
    %c0_37 = arith.constant 0 : index
    %c224_38 = arith.constant 224 : index
    %82 = vector.load %arg2[%c0_37, %c224_38] : memref<2x256xf32, #tpu.memory_space<vmem>>, vector<2x32xf32>
    %83 = vector.extract_strided_slice %46 {offsets = [0, 7], sizes = [2, 1], strides = [1, 1]} : vector<2x8xf32> to vector<2x1xf32>
    %84 = vector.broadcast %83 : vector<2x1xf32> to vector<2x32xf32>
    %85 = arith.mulf %84, %82 : vector<2x32xf32>
    %86 = arith.addf %81, %85 : vector<2x32xf32>
    %cst_39 = arith.constant 5.000000e-01 : f32
    %87 = vector.broadcast %cst_39 : f32 to vector<2x32xf32>
    %88 = arith.mulf %86, %87 : vector<2x32xf32>
    %c0_40 = arith.constant 0 : index
    %c0_41 = arith.constant 0 : index
    %89 = vector.load %arg4[%c0_40, %c0_41] : memref<2x32xf32, #tpu.memory_space<vmem>>, vector<2x32xf32>
    tpu.vector_store %arg4[%c0_40, %c0_41], %88 {strides = array<i32>} : memref<2x32xf32, #tpu.memory_space<vmem>>, vector<2x32xf32>,
    %c0_42 = arith.constant 0 : index
    %c0_43 = arith.constant 0 : index
    %90 = vector.load %arg5[%c0_42, %c0_43] : memref<2x8xf32, #tpu.memory_space<vmem>>, vector<2x8xf32>
    tpu.vector_store %arg5[%c0_42, %c0_43], %46 {strides = array<i32>} : memref<2x8xf32, #tpu.memory_space<vmem>>, vector<2x8xf32>,
    return
  }
  func.func @transform_0(%arg0: i32) -> (i32, i32) {
    %c0_i32 = arith.constant 0 : i32
    %c0_i32_0 = arith.constant 0 : i32
    return %arg0, %c0_i32 : i32, i32
  }
  func.func @transform_1(%arg0: i32) -> (i32, i32) {
    %c0_i32 = arith.constant 0 : i32
    %c0_i32_0 = arith.constant 0 : i32
    return %arg0, %c0_i32 : i32, i32
  }
  func.func @transform_2(%arg0: i32) -> (i32, i32) {
    %c0_i32 = arith.constant 0 : i32
    %c0_i32_0 = arith.constant 0 : i32
    %c0_i32_1 = arith.constant 0 : i32
    return %c0_i32, %c0_i32_0 : i32, i32
  }
  func.func @transform_3(%arg0: i32) -> (i32, i32) {
    %c0_i32 = arith.constant 0 : i32
    %c0_i32_0 = arith.constant 0 : i32
    return %arg0, %c0_i32 : i32, i32
  }
  func.func @transform_4(%arg0: i32) -> (i32, i32) {
    %c0_i32 = arith.constant 0 : i32
    %c0_i32_0 = arith.constant 0 : i32
    return %arg0, %c0_i32 : i32, i32
  }
}

</mosaic_0001>

<bundles_post_ra>
// kernel: tpu_custom_call.1
= control target key start
LH: loop header
LB: loop body
LE: loop exit
PB: predicated region body
PF: predicated region fallthrough
CT: control target
= control target key end

     0   :  { %10 = vsyncpa [#allocation3], 0  ;;  %s594_s0 = inlined_call_operand.hbm [shape: f32[2,32], index: 0, kind: input, shape index: {}]   ;;  %s595_s1 = inlined_call_operand.hbm [shape: f32[2,256], index: 1, kind: input, shape index: {}]   ;;  %s596_s2 = inlined_call_operand.hbm [shape: f32[32,32], index: 2, kind: input, shape index: {}]   ;;  %s597_s3 = inlined_call_operand.hbm [shape: f32[2,32], index: 3, kind: output, shape index: {0}]   ;;  %s598_s4 = inlined_call_operand.hbm [shape: f32[2,8], index: 4, kind: output, shape index: {1}]  }
   0x1   :  { %11 = vsyncpa [#allocation6], 0 }
   0x2   :  { %12 = vsyncpa [#allocation4], 0  ;;  %s30_s17 = sshll.u32 %s595_s1, 4  ;;  %s31_s17 = int_to_ptr.hbm [resolvable:$true] %s30_s17 }
   0x3   :  { %13 = vsyncpa [#allocation10], 0  ;;  %s480_s18 = smov [#allocation5]   ;;  %s19_s22 = sshll.u32 %s594_s0, 4  ;;  %s20_s22 = int_to_ptr.hbm [resolvable:$true] %s19_s22 }
   0x4   :  { %s32_s19 = sshll.u32 %s480_s18, 4  ;;  %s481_s23 = smov [#allocation2]   ;;  %s33_s19 = int_to_ptr.vmem [resolvable:$true] %s32_s19 }
   0x5   :  { %35 = dma.hbm_to_vmem [thread:$0]  %s31_s17, 64, %s33_s19, [#allocation6]  }
   0x6   :  { %s21_s24 = sshll.u32 %s481_s23, 4  ;;  %s40_s27 = sshll.u32 %s596_s2, 4  ;;  %s22_s24 = int_to_ptr.vmem [resolvable:$true] %s21_s24  ;;  %s41_s27 = int_to_ptr.hbm [resolvable:$true] %s40_s27 }
   0x7   :  { %24 = dma.hbm_to_vmem [thread:$0]  %s20_s22, 32, %s22_s24, [#allocation3]  }
   0x8   :  { %s482_s1 = smov [#allocation7]   ;;  %s483_s29 = smov 128  }
   0x9   :  { %s42_s28 = sshll.u32 %s482_s1, 4  ;;  %s484_s30 = smov 8   ;;  %s43_s28 = int_to_ptr.vmem [resolvable:$true] %s42_s28 }
   0xa   :  { %48 = dma.hbm_to_vmem [thread:$0]  %s41_s27, 512, %s43_s28, [#allocation6], %s483_s29, %s483_s29, %s484_s30  }
   0xb   :  { %472 = dma.done.wait [#allocation3], 32  }
   0xc   :  { %473 = vsyncadd [#allocation3], 4294967264 }
   0xd   :  { %474 = dma.done.wait [#allocation6], 576  }
   0xe   :  { %475 = vsyncadd [#allocation6], 4294966720  ;;  %v65_v0 = vld [vmem:[#allocation7 + $0x18] sm:$0xff]  ;;  %v64_v1 = vld [vmem:[#allocation7 + $0x10] sm:$0xff]  ;;  %vm66_vm0 = vcmask 261120   ;;  %s485_s0 = smov 96  }
   0xf   :  { %82 = vmatpush.msra.mxu0 %v65_v0  ;;  %v532_v2 = vld [vmem:[#allocation5] sm:$0x3]  ;;  %v63_v3 = vld [vmem:[#allocation7 + $0x8] sm:$0xff]  ;;  %v62_v4 = vld [vmem:[#allocation7] sm:$0xff]  ;;  %s486_s2 = smov 64   ;;  %s487_s5 = smov 32  }
  0x10   :  { %97 = vst [vmem:[#allocation1] ss:$4 sm:$0xff] %v532_v2  ;;  %v535_v5 = vld [vmem:[#allocation2] sm:$0x3]  ;;  %v537_v6 = vld [vmem:[#allocation5] sm:$0x3] }
  0x11   :  { %83 = vmatpush.msra.mxu0 %v64_v1  ;;  %v542_v8 = vld [vmem:[#allocation5] sm:$0x3]  ;;  %v546_v10 = vld [vmem:[#allocation5 + $0x2] sm:$0x3]  ;;  %vm92_vm1 = vcmask 254976   ;;  %vm165_vm2 = vcmask 7168  }
  0x12   :  { %v550_v12 = vld [vmem:[#allocation5 + $0x2] sm:$0x3]  ;;  %vm167_vm3 = vcmask 15360   ;;  %vm169_vm4 = vcmask 23552   ;;  %vm171_vm5 = vcmask 31744   ;;  %vm173_vm6 = vcmask 39936  }
  0x13   :  { %84 = vmatpush.msra.mxu0 %v63_v3  ;;  %v554_v14 = vld [vmem:[#allocation5 + $0x2] sm:$0x3]  ;;  %vm175_vm7 = vcmask 48128   ;;  %vm177_vm8 = vcmask 56320   ;;  %vm180_vm9 = vcmask 58368   ;;  %v488_v62 = vmov 1  }
  0x14   :  { %341 = vset.pattern.permute.xlu1 %v488_v62  ;;  %v489_v63 = vmov 0   ;;  %s496_s6 = smov [#allocation9]   ;;  %s305_s10 = sshll.u32 %s598_s4, 4  ;;  %s306_s10 = int_to_ptr.hbm [resolvable:$true] %s305_s10 }
  0x15   :  { %85 = vmatpush.msra.mxu0 %v62_v4  ;;  %340 = vset.pattern.permute.xlu0 %v489_v63  ;;  %s303_s7 = sshll.u32 %s496_s6, 4  ;;  %s497_s4 = smov [#allocation8]   ;;  %s304_s7 = int_to_ptr.vmem [resolvable:$true] %s303_s7 }
  0x16   :  { %321 = vmatmul.msk.f32.vlgmr.msra.gmra.mxu0 %vm66_vm0, %v535_v5  ;;  %s292_s11 = sshll.u32 %s497_s4, 4  ;;  %s294_s14 = sshll.u32 %s597_s3, 4  ;;  %s293_s11 = int_to_ptr.vmem [resolvable:$true] %s292_s11  ;;  %s295_s14 = int_to_ptr.hbm [resolvable:$true] %s294_s14 }
  0x17   :  { %v98_v7 = vld.sshfl [vmem:[#allocation1] sm:$0xff pattern:$0x73625140] }
  0x18   :  { %99 = vrot.lane.b32.xlu0 %v98_v7, %s485_s0  ;;  %108 = vst [vmem:[#allocation1] ss:$4 sm:$0xff] %v537_v6 }
  0x1f   :  { %v109_v9 = vld.sshfl [vmem:[#allocation1] sm:$0xff pattern:$0x73625140] }
  0x20   :  { %110 = vrot.lane.b32.xlu0 %v109_v9, %s486_s2  ;;  %119 = vst [vmem:[#allocation1] ss:$4 sm:$0xff] %v542_v8 }
  0x27   :  { %v120_v11 = vld.sshfl [vmem:[#allocation1] sm:$0xff pattern:$0x73625140] }
  0x28   :  { %121 = vrot.lane.b32.xlu1 %v120_v11, %s487_s5  ;;  %134 = vst [vmem:[#allocation1] ss:$4 sm:$0xff] %v546_v10 }
  0x2f   :  { %v135_v13 = vld.sshfl [vmem:[#allocation1] sm:$0xff pattern:$0x73625140] }
  0x30   :  { %136 = vrot.lane.b32.xlu1 %v135_v13, %s485_s0  ;;  %145 = vst [vmem:[#allocation1] ss:$4 sm:$0xff] %v550_v12 }
  0x37   :  { %v146_v15 = vld.sshfl [vmem:[#allocation1] sm:$0xff pattern:$0x73625140] }
  0x38   :  { %147 = vrot.lane.b32.xlu2 %v146_v15, %s486_s2  ;;  %156 = vst [vmem:[#allocation1] ss:$4 sm:$0xff] %v554_v14 }
  0x3f   :  { %v157_v16 = vld.sshfl [vmem:[#allocation1] sm:$0xff pattern:$0x73625140] }
  0x40   :  { %158 = vrot.lane.b32.xlu2 %v157_v16, %s487_s5  ;;  %216 = vst [vmem:[#allocation1] ss:$4 sm:$0xff] %v532_v2 }
  0x47   :  { %v217_v0 = vld.sshfl [vmem:[#allocation1] sm:$0xff pattern:$0x73625140] }
  0x48   :  { %227 = vst [vmem:[#allocation1] ss:$4 sm:$0xff] %v537_v6 }
  0x4f   :  { %v228_v3 = vld.sshfl [vmem:[#allocation1] sm:$0xff pattern:$0x73625140] }
  0x50   :  { %238 = vst [vmem:[#allocation1] ss:$4 sm:$0xff] %v542_v8 }
  0x57   :  { %v239_v9 = vld.sshfl [vmem:[#allocation1] sm:$0xff pattern:$0x73625140] }
  0x58   :  { %255 = vst [vmem:[#allocation1] ss:$4 sm:$0xff] %v546_v10 }
  0x8a   :  { %v100_v17 = vpop.permute.xlu0 %99 }
  0x92   :  { %v111_v18 = vpop.permute.xlu0 %110  ;;  %v148_v23 = vpop.permute.xlu2 %147 }
  0x93   :  { %v87_v19 = vpop.f32.mrf.mxu0 }
  0x94   :  { %v113_v20 = vmul.f32 %v111_v18, %v87_v19  ;;  %v102_v21 = vmul.f32 %v100_v17, %v87_v19  ;;  %v91_v22 = vmul.f32 %v532_v2, %v87_v19  ;;  %v129_v29 = vmul.f32 %v546_v10, %v87_v19 }
  0x95   :  { %v150_v34 = vmul.f32 %v148_v23, %v87_v19  ;;  %v491_v23 = vmov 4  }
  0x96   :  { %v114_v24 = vsel %vm92_vm1, %v113_v20, 0.0  ;;  %v103_v25 = vsel %vm92_vm1, %v102_v21, 0.0  ;;  %v93_v26 = vsel %vm92_vm1, %v91_v22, 0.0  ;;  %v130_v31 = vsel %vm92_vm1, %v129_v29, 0.0 }
  0x97   :  { %115 = vadd.xlane.f32.xlu2 %v114_v24  ;;  %104 = vadd.xlane.f32.xlu1 %v103_v25  ;;  %v151_v38 = vsel %vm92_vm1, %v150_v34, 0.0  ;;  %v490_v22 = vmov 2   ;;  %v492_v24 = vmov 3   ;;  %v494_v25 = vmov 5  }
  0x98   :  { %94 = vadd.xlane.f32.xlu0 %v93_v26  ;;  %v495_v26 = vmov 6  }
  0x9a   :  { %v122_v27 = vpop.permute.xlu1 %121  ;;  %v159_v32 = vpop.permute.xlu2 %158 }
  0x9b   :  { %v124_v28 = vmul.f32 %v122_v27, %v87_v19  ;;  %v161_v35 = vmul.f32 %v159_v32, %v87_v19 }
  0x9d   :  { %v125_v30 = vsel %vm92_vm1, %v124_v28, 0.0  ;;  %v162_v39 = vsel %vm92_vm1, %v161_v35, 0.0 }
  0x9f   :  { %126 = vadd.xlane.f32.xlu2 %v125_v30 }
  0xa0   :  { %131 = vadd.xlane.f32.xlu0 %v130_v31 }
  0xa2   :  { %v137_v33 = vpop.permute.xlu1 %136 }
  0xa3   :  { %v139_v36 = vmul.f32 %v137_v33, %v87_v19  ;;  %v256_v19 = vld.sshfl [vmem:[#allocation1] sm:$0xff pattern:$0x73625140] }
  0xa4   :  { %266 = vst [vmem:[#allocation1] ss:$4 sm:$0xff] %v550_v12  ;;  %v493_v12 = vmov 7  }
  0xa5   :  { %v140_v37 = vsel %vm92_vm1, %v139_v36, 0.0 }
  0xa6   :  { %141 = vadd.xlane.f32.xlu1 %v140_v37 }
  0xa7   :  { %152 = vadd.xlane.f32.xlu2 %v151_v38 }
  0xa8   :  { %163 = vadd.xlane.f32.xlu0 %v162_v39 }
  0xab   :  { %v267_v21 = vld.sshfl [vmem:[#allocation1] sm:$0xff pattern:$0x73625140] }
  0xac   :  { %277 = vst [vmem:[#allocation1] ss:$4 sm:$0xff] %v554_v14 }
  0xb3   :  { %v278_v14 = vld.sshfl [vmem:[#allocation1] sm:$0xff pattern:$0x73625140] }
 0x10a   :  { %v116_v40 = vpop.xlane.xlu2 %115  ;;  %v105_v42 = vpop.xlane.xlu1 %104 }
 0x10b   :  { %v95_v41 = vpop.xlane.xlu0 %94 }
 0x10c   :  { %v166_v43 = vsel %vm165_vm2, %v95_v41, %v105_v42 }
 0x10d   :  { %v168_v46 = vsel %vm167_vm3, %v166_v43, %v116_v40 }
 0x112   :  { %v127_v44 = vpop.xlane.xlu2 %126 }
 0x113   :  { %v132_v45 = vpop.xlane.xlu0 %131  ;;  %v170_v47 = vsel %vm169_vm4, %v168_v46, %v127_v44 }
 0x114   :  { %v172_v48 = vsel %vm171_vm5, %v170_v47, %v132_v45 }
 0x119   :  { %v142_v49 = vpop.xlane.xlu1 %141 }
 0x11a   :  { %v174_v50 = vsel %vm173_vm6, %v172_v48, %v142_v49  ;;  %v153_v51 = vpop.xlane.xlu2 %152 }
 0x11b   :  { %v176_v52 = vsel %vm175_vm7, %v174_v50, %v153_v51  ;;  %v164_v53 = vpop.xlane.xlu0 %163 }
 0x11c   :  { %v178_v54 = vsel %vm177_vm8, %v176_v52, %v164_v53 }
 0x11d   :  { %v179_v55 = vmul.f32 0.17677669, %v178_v54 }
 0x11f   :  { %v181_v56 = vsel %vm180_vm9, %v179_v55, -inf }
 0x120   :  { %182 = vmax.xlane.f32.xlu1 %v181_v56 }
 0x193   :  { %v183_v57 = vpop.xlane.xlu1 %182 }
 0x194   :  { %v184_v58 = vsub.f32 %v179_v55, %v183_v57 }
 0x196   :  { %v185_v59 = vmul.f32 1.442695, %v184_v58 }
 0x198   :  { %348 = vpow2.f32 %v185_v59 }
 0x19e   :  { %v349_v60 = vpop.eup %348 }
 0x19f   :  { %v187_v61 = vsel %vm180_vm9, %v349_v60, 0.0 }
 0x1a0   :  { %188 = vadd.xlane.f32.xlu2 %v187_v61 }
 0x1b8   :  { %218 = vrot.lane.b32.xlu2 %v217_v0, %s485_s0 }
 0x1c0   :  { %229 = vrot.lane.b32.xlu2 %v228_v3, %s486_s2 }
 0x1c8   :  { %240 = vrot.lane.b32.xlu2 %v239_v9, %s487_s5 }
 0x1d0   :  { %257 = vrot.lane.b32.xlu2 %v256_v19, %s485_s0 }
 0x1d8   :  { %268 = vrot.lane.b32.xlu2 %v267_v21, %s486_s2 }
 0x213   :  { %v189_v1 = vpop.xlane.xlu2 %188 }
 0x214   :  { %350 = vrcp.f32 %v189_v1  ;;  %v201_v13 = vand.u32 2147483648, %v189_v1  ;;  %v199_v6 = vand.u32 2147483647, %v189_v1  ;;  %vm195_vm11 = vweird.f32 %v189_v1 }
 0x216   :  { %v202_v17 = vor.u32 1.1754944e-38, %v201_v13  ;;  %vm200_vm13 = vcmp.eq.f32.partialorder %v199_v6, 8.507059e+37 }
 0x21a   :  { %v351_v4 = vpop.eup %350 }
 0x21b   :  { %v191_v7 = vmul.f32 %v351_v4, %v189_v1  ;;  %vm196_vm10 = vweird.f32 %v351_v4  ;;  %v219_v27 = vpop.permute.xlu2 %218 }
 0x21c   :  { %vm197_vm12 = vmor %vm195_vm11, %vm196_vm10 }
 0x21d   :  { %v192_v11 = vsub.f32 1.0, %v191_v7 }
 0x21f   :  { %v193_v15 = vmul.f32 %v351_v4, %v192_v11 }
 0x221   :  { %v194_v16 = vadd.f32 %v351_v4, %v193_v15 }
 0x223   :  { %v198_v18 = vsel %vm197_vm12, %v351_v4, %v194_v16  ;;  %v230_v29 = vpop.permute.xlu2 %229 }
 0x224   :  { %v203_v8 = vsel %vm200_vm13, %v202_v17, %v198_v18 }
 0x225   :  { %v204_v20 = vmul.f32 %v349_v60, %v203_v8 }
 0x227   :  { %286 = vst.msk [vmem:[#allocation9] sm:$0x3] %vm180_vm9, %v204_v20  ;;  %213 = vperm.xlu1 %341, %v204_v20   ;;  %207 = vperm.xlu0 %340, %v204_v20  }
 0x228   :  { %308 = dma.vmem_to_hbm [thread:$0]  %s304_s7, 32, %s306_s10, [#allocation10]  }
 0x22b   :  { %v241_v32 = vpop.permute.xlu2 %240 }
 0x22f   :  { %342 = vset.pattern.permute.xlu1 %v490_v22  ;;  %344 = vset.pattern.permute.xlu0 %v491_v23 }
 0x230   :  { %224 = vperm.xlu1 %342, %v204_v20   ;;  %246 = vperm.xlu0 %344, %v204_v20  }
 0x233   :  { %v258_v36 = vpop.permute.xlu2 %257 }
 0x238   :  { %343 = vset.pattern.permute.xlu1 %v492_v24  ;;  %347 = vset.pattern.permute.xlu0 %v493_v12 }
 0x239   :  { %235 = vperm.xlu1 %343, %v204_v20   ;;  %274 = vperm.xlu0 %347, %v204_v20  }
 0x23b   :  { %v269_v46 = vpop.permute.xlu2 %268 }
 0x241   :  { %345 = vset.pattern.permute.xlu1 %v494_v25 }
 0x242   :  { %252 = vperm.xlu1 %345, %v204_v20  }
 0x24a   :  { %346 = vset.pattern.permute.xlu1 %v495_v26 }
 0x24b   :  { %263 = vperm.xlu1 %346, %v204_v20  }
 0x253   :  { %279 = vrot.lane.b32.xlu1 %v278_v14, %s487_s5 }
 0x299   :  { %v214_v28 = vpop.permute.xlu1 %213  ;;  %v208_v33 = vpop.permute.xlu0 %207 }
 0x29a   :  { %v210_v34 = vmul.f32 %v208_v33, %v532_v2  ;;  %v221_v38 = vmul.f32 %v219_v27, %v214_v28 }
 0x29c   :  { %v211_v37 = vadd.f32 %v210_v34, %v535_v5 }
 0x29e   :  { %v222_v40 = vadd.f32 %v221_v38, %v211_v37 }
 0x2a2   :  { %v225_v30 = vpop.permute.xlu1 %224  ;;  %v247_v42 = vpop.permute.xlu0 %246 }
 0x2a3   :  { %v232_v39 = vmul.f32 %v230_v29, %v225_v30  ;;  %v249_v47 = vmul.f32 %v247_v42, %v546_v10 }
 0x2a5   :  { %v233_v43 = vadd.f32 %v232_v39, %v222_v40 }
 0x2ab   :  { %v236_v31 = vpop.permute.xlu1 %235  ;;  %v275_v2 = vpop.permute.xlu0 %274 }
 0x2ac   :  { %v243_v41 = vmul.f32 %v241_v32, %v236_v31 }
 0x2ae   :  { %v244_v45 = vadd.f32 %v243_v41, %v233_v43 }
 0x2b0   :  { %v250_v49 = vadd.f32 %v249_v47, %v244_v45 }
 0x2b4   :  { %v253_v35 = vpop.permute.xlu1 %252 }
 0x2b5   :  { %v260_v48 = vmul.f32 %v258_v36, %v253_v35 }
 0x2b7   :  { %v261_v51 = vadd.f32 %v260_v48, %v250_v49 }
 0x2bd   :  { %v264_v44 = vpop.permute.xlu1 %263 }
 0x2be   :  { %v271_v50 = vmul.f32 %v269_v46, %v264_v44 }
 0x2c0   :  { %v272_v53 = vadd.f32 %v271_v50, %v261_v51 }
 0x2c5   :  { %v280_v52 = vpop.permute.xlu1 %279 }
 0x2c6   :  { %v282_v54 = vmul.f32 %v280_v52, %v275_v2 }
 0x2c8   :  { %v283_v5 = vadd.f32 %v282_v54, %v272_v53 }
 0x2ca   :  { %v284_v55 = vmul.f32 0.5, %v283_v5 }
 0x2cc   :  { %285 = vst.msk [vmem:[#allocation8] sm:$0x3] %vm92_vm1, %v284_v55 }
 0x2cd   :  { %297 = dma.vmem_to_hbm [thread:$0]  %s293_s11, 32, %s295_s14, [#allocation4]  }
 0x2ce   :  { %476 = dma.done.wait [#allocation4], 32  }
 0x2cf   :  { %477 = vsyncadd [#allocation4], 4294967264 }
 0x2d0   :  { %478 = dma.done.wait [#allocation10], 32  }
 0x2d1   :  { %479 = vsyncadd [#allocation10], 4294967264 }
 0x2d2   :  { %317 = vsyncpa [#allocation3], 1 }
 0x2d3   :  { %318 = vsyncpa [#allocation6], 1 }
 0x2d4   :  { %319 = vsyncpa [#allocation4], 1 }
 0x2d5   :  { %320 = vsyncpa [#allocation10], 1 }

</bundles_post_ra>
